<compile_context>
chip_gen: v6e
topology: v6e:2x2x1
jax: 0.10.0
libtpu: 0.0.40
codegen_flags: <defaults>
</compile_context>

<pallas_src>
import functools
import math

import jax
import jax.numpy as jnp
from jax.experimental import pallas as pl
from jax.experimental.pallas import tpu as pltpu


def _round_up(x, m):
    return ((x + m - 1) // m) * m


def qfourier_kernel(num_inputs, xu_ref, w1_ref, b1_ref, w2_ref, b2_ref,
                    w3_ref, b3_ref, wf_ref, bf_ref, q_ref, fbw_ref):
    """Fused Q head + filterbw head on one transposed batch tile."""
    xu = xu_ref[...]                                          # (din, bb)
    h1 = jnp.dot(w1_ref[...], xu, preferred_element_type=jnp.float32)
    h1 = jnp.maximum(h1 + b1_ref[...], 0.0)                   # (hidden, bb)
    h2 = jnp.dot(w2_ref[...], h1, preferred_element_type=jnp.float32)
    h2 = jnp.maximum(h2 + b2_ref[...], 0.0)                   # (hidden, bb)
    # linear3 has out-dim 1: VPU multiply + sublane reduce instead of an MXU
    # matmul whose N dimension would waste nearly all result lanes.
    q = jnp.sum(h2 * w3_ref[...], axis=0, keepdims=True) + b3_ref[0, 0]
    q_ref[...] = q.astype(q_ref.dtype)                        # (1, bb) lane-dense
    # filterbw head only sees the state rows of the concatenated input.
    s = xu[:num_inputs, :]                                    # (num_inputs, bb)
    f = jnp.dot(wf_ref[...], s, preferred_element_type=jnp.float32)
    fbw_ref[...] = jax.nn.sigmoid(f + bf_ref[...]).astype(fbw_ref.dtype)


@functools.partial(jax.jit, static_argnames=("block_b",))
def qfourier_forward(state, action, w1, b1, w2, b2, w3, b3, wf, bf,
                     *, block_b=512):
    """Pallas forward for Qfourier (filter='none'). Returns (q, fbw)."""
    B, num_inputs = state.shape
    num_actions = action.shape[1]
    hidden_dim = w1.shape[0]
    din = num_inputs + num_actions
    n_f = wf.shape[0]                     # filterbw output dim (= 3)

    LANE = 128
    b_lane = _round_up(B, LANE)
    bb = _round_up(min(block_b, b_lane), LANE)
    # Keep >= 2 grid steps when there is more than one lane-tile of batch so
    # v7x's two TensorCores (the "parallel" grid axis) both get work; this is
    # a no-op on single-core v5e/v6e.
    if b_lane >= 2 * LANE and bb >= b_lane:
        bb = _round_up(b_lane // 2, LANE)
    B_pad = _round_up(B, bb)

    # Transposed layout: batch on the lane axis, padded to whole tiles.
    xu_t = jnp.concatenate([state, action], axis=1).T         # (din, B)
    xu_t = jnp.pad(xu_t, ((0, 0), (0, B_pad - B)))

    b1c = b1.reshape(hidden_dim, 1)
    b2c = b2.reshape(hidden_dim, 1)
    w3c = w3.reshape(hidden_dim, 1)       # torch linear3.weight is (1, hidden)
    b3s = b3.reshape(1, 1)                # scalar bias -> SMEM
    bfc = bf.reshape(n_f, 1)

    full = lambda i: (0, 0)
    kernel = functools.partial(qfourier_kernel, num_inputs)
    q_t, fbw_t = pl.pallas_call(
        kernel,
        out_shape=(
            jax.ShapeDtypeStruct((1, B_pad), jnp.float32),
            jax.ShapeDtypeStruct((n_f, B_pad), jnp.float32),
        ),
        grid_spec=pltpu.PrefetchScalarGridSpec(
            num_scalar_prefetch=0,
            grid=(B_pad // bb,),
            in_specs=[
                pl.BlockSpec((din, bb), lambda i: (0, i)),           # xu^T tile
                pl.BlockSpec((hidden_dim, din), full),               # W1
                pl.BlockSpec((hidden_dim, 1), full),                 # b1
                pl.BlockSpec((hidden_dim, hidden_dim), full),        # W2
                pl.BlockSpec((hidden_dim, 1), full),                 # b2
                pl.BlockSpec((hidden_dim, 1), full),                 # w3 column
                pl.BlockSpec(memory_space=pltpu.MemorySpace.SMEM),   # b3 scalar
                pl.BlockSpec((n_f, num_inputs), full),               # filterbw W
                pl.BlockSpec((n_f, 1), full),                        # filterbw b
            ],
            out_specs=(
                pl.BlockSpec((1, bb), lambda i: (0, i)),             # q^T
                pl.BlockSpec((n_f, bb), lambda i: (0, i)),           # fbw^T
            ),
        ),
        compiler_params=pltpu.CompilerParams(
            dimension_semantics=("parallel",)),
    )(xu_t, w1, b1c, w2, b2c, w3c, b3s, wf, bfc)

    # Back to the PyTorch row-major (B, ...) layout; drop batch padding.
    return q_t.T[:B], fbw_t.T[:B]


def xavier_uniform(key, fan_out, fan_in, gain=1.0):
    # Matches torch.nn.init.xavier_uniform_ on a torch (out, in) Linear weight.
    bound = gain * math.sqrt(6.0 / (fan_in + fan_out))
    return jax.random.uniform(key, (fan_out, fan_in), jnp.float32,
                              minval=-bound, maxval=bound)


def init_qfourier_params(key, num_inputs, num_actions, hidden_dim):
    k1, k2, k3, k4 = jax.random.split(key, 4)
    din = num_inputs + num_actions
    w1 = xavier_uniform(k1, hidden_dim, din)
    b1 = jnp.zeros((hidden_dim,), jnp.float32)
    w2 = xavier_uniform(k2, hidden_dim, hidden_dim)
    b2 = jnp.zeros((hidden_dim,), jnp.float32)
    w3 = xavier_uniform(k3, 1, hidden_dim)
    b3 = jnp.zeros((1,), jnp.float32)
    wf = xavier_uniform(k4, 3, num_inputs)
    bf = jnp.zeros((3,), jnp.float32)
    return w1, b1, w2, b2, w3, b3, wf, bf


def reference_forward(state, action, w1, b1, w2, b2, w3, b3, wf, bf):
    xu = jnp.concatenate([state, action], axis=1)
    x = jax.nn.relu(xu @ w1.T + b1)
    x = jax.nn.relu(x @ w2.T + b2)
    q = x @ w3.T + b3
    fbw = jax.nn.sigmoid(state @ wf.T + bf)
    return q, fbw


if __name__ == "__main__":
    key = jax.random.PRNGKey(0)
    kp, kb, ks, ka = jax.random.split(key, 4)

    batch, num_inputs, num_actions, hidden_dim = 8, 16, 3, 32
    w1, b1, w2, b2, w3, b3, wf, bf = init_qfourier_params(
        kp, num_inputs, num_actions, hidden_dim)
    # The module zero-inits biases (weights_init_); use small random biases
    # here so the bias datapath is actually exercised by the check.
    kb1, kb2, kb3, kbf = jax.random.split(kb, 4)
    b1 = 0.1 * jax.random.normal(kb1, b1.shape, jnp.float32)
    b2 = 0.1 * jax.random.normal(kb2, b2.shape, jnp.float32)
    b3 = 0.1 * jax.random.normal(kb3, b3.shape, jnp.float32)
    bf = 0.1 * jax.random.normal(kbf, bf.shape, jnp.float32)

    state = jax.random.normal(ks, (batch, num_inputs), jnp.float32)
    action = jax.random.normal(ka, (batch, num_actions), jnp.float32)

    q, fbw = qfourier_forward(state, action, w1, b1, w2, b2, w3, b3, wf, bf,
                              block_b=512)
    q, fbw = jax.block_until_ready((q, fbw))

    q_ref, fbw_ref = reference_forward(state, action, w1, b1, w2, b2, w3, b3,
                                       wf, bf)
    assert q.shape == (batch, 1), q.shape
    assert fbw.shape == (batch, 3), fbw.shape
    assert jnp.allclose(q, q_ref, atol=1e-5, rtol=1e-5), (q, q_ref)
    assert jnp.allclose(fbw, fbw_ref, atol=1e-5, rtol=1e-5), (fbw, fbw_ref)
    print("KERNEL_OK")
</pallas_src>

<mosaic_0001>
module attributes {stable_mosaic.version = 11 : i64} {
  func.func @qfourier_kernel(%arg0: i32, %arg1: memref<19x128xf32, #tpu.memory_space<vmem>>, %arg2: memref<32x19xf32, #tpu.memory_space<vmem>>, %arg3: memref<32x1xf32, #tpu.memory_space<vmem>>, %arg4: memref<32x32xf32, #tpu.memory_space<vmem>>, %arg5: memref<32x1xf32, #tpu.memory_space<vmem>>, %arg6: memref<32x1xf32, #tpu.memory_space<vmem>>, %arg7: memref<1x1xf32, #tpu.memory_space<smem>>, %arg8: memref<3x16xf32, #tpu.memory_space<vmem>>, %arg9: memref<3x1xf32, #tpu.memory_space<vmem>>, %arg10: memref<1x128xf32, #tpu.memory_space<vmem>>, %arg11: memref<3x128xf32, #tpu.memory_space<vmem>>) attributes {dimension_semantics = [#tpu.dimension_semantics<parallel>], iteration_bounds = array<i64: 1>, scalar_prefetch = 0 : i64, scratch_operands = 0 : i64, tpu.core_type = #tpu.core_type<tc>, window_params = [{transform_indices = @transform_0, window_bounds = array<i64: 19, 128>}, {pipeline_mode = #tpu.pipeline_mode<synchronous>, transform_indices = @transform_1, window_bounds = array<i64: 32, 19>}, {pipeline_mode = #tpu.pipeline_mode<synchronous>, transform_indices = @transform_2, window_bounds = array<i64: 32, 1>}, {pipeline_mode = #tpu.pipeline_mode<synchronous>, transform_indices = @transform_3, window_bounds = array<i64: 32, 32>}, {pipeline_mode = #tpu.pipeline_mode<synchronous>, transform_indices = @transform_4, window_bounds = array<i64: 32, 1>}, {pipeline_mode = #tpu.pipeline_mode<synchronous>, transform_indices = @transform_5, window_bounds = array<i64: 32, 1>}, {transform_indices = @transform_6, window_bounds = array<i64: 1, 1>}, {pipeline_mode = #tpu.pipeline_mode<synchronous>, transform_indices = @transform_7, window_bounds = array<i64: 3, 16>}, {pipeline_mode = #tpu.pipeline_mode<synchronous>, transform_indices = @transform_8, window_bounds = array<i64: 3, 1>}, {transform_indices = @transform_9, window_bounds = array<i64: 1, 128>}, {transform_indices = @transform_10, window_bounds = array<i64: 3, 128>}]} {
    %c0 = arith.constant 0 : index
    %c0_0 = arith.constant 0 : index
    %0 = vector.load %arg1[%c0, %c0_0] : memref<19x128xf32, #tpu.memory_space<vmem>>, vector<19x128xf32>
    %c0_1 = arith.constant 0 : index
    %c0_2 = arith.constant 0 : index
    %1 = vector.load %arg2[%c0_1, %c0_2] : memref<32x19xf32, #tpu.memory_space<vmem>>, vector<32x19xf32>
    %cst = arith.constant dense<0.000000e+00> : vector<32x128xf32>
    %2 = tpu.matmul %1, %0, %cst {dimension_numbers = #tpu.dot_dimension_numbers<[1], [0], [0], [1], [0, 0, 1, 1], [], []>} : vector<32x19xf32>, vector<19x128xf32>, vector<32x128xf32> -> vector<32x128xf32>
    %c0_3 = arith.constant 0 : index
    %c0_4 = arith.constant 0 : index
    %3 = vector.load %arg3[%c0_3, %c0_4] : memref<32x1xf32, #tpu.memory_space<vmem>>, vector<32x1xf32>
    %4 = vector.broadcast %3 : vector<32x1xf32> to vector<32x128xf32>
    %5 = arith.addf %2, %4 : vector<32x128xf32>
    %cst_5 = arith.constant 0.000000e+00 : f32
    %6 = vector.broadcast %cst_5 : f32 to vector<32x128xf32>
    %7 = arith.maximumf %5, %6 : vector<32x128xf32>
    %c0_6 = arith.constant 0 : index
    %c0_7 = arith.constant 0 : index
    %8 = vector.load %arg4[%c0_6, %c0_7] : memref<32x32xf32, #tpu.memory_space<vmem>>, vector<32x32xf32>
    %cst_8 = arith.constant dense<0.000000e+00> : vector<32x128xf32>
    %9 = tpu.matmul %8, %7, %cst_8 {dimension_numbers = #tpu.dot_dimension_numbers<[1], [0], [0], [1], [0, 0, 1, 1], [], []>} : vector<32x32xf32>, vector<32x128xf32>, vector<32x128xf32> -> vector<32x128xf32>
    %c0_9 = arith.constant 0 : index
    %c0_10 = arith.constant 0 : index
    %10 = vector.load %arg5[%c0_9, %c0_10] : memref<32x1xf32, #tpu.memory_space<vmem>>, vector<32x1xf32>
    %11 = vector.broadcast %10 : vector<32x1xf32> to vector<32x128xf32>
    %12 = arith.addf %9, %11 : vector<32x128xf32>
    %cst_11 = arith.constant 0.000000e+00 : f32
    %13 = vector.broadcast %cst_11 : f32 to vector<32x128xf32>
    %14 = arith.maximumf %12, %13 : vector<32x128xf32>
    %c0_12 = arith.constant 0 : index
    %c0_13 = arith.constant 0 : index
    %15 = vector.load %arg6[%c0_12, %c0_13] : memref<32x1xf32, #tpu.memory_space<vmem>>, vector<32x1xf32>
    %16 = vector.broadcast %15 : vector<32x1xf32> to vector<32x128xf32>
    %17 = arith.mulf %14, %16 : vector<32x128xf32>
    %cst_14 = arith.constant dense<0.000000e+00> : vector<128xf32>
    %18 = vector.multi_reduction <add>, %17, %cst_14 [0] : vector<32x128xf32> to vector<128xf32>
    %19 = vector.shape_cast %18 : vector<128xf32> to vector<1x128xf32>
    %c0_15 = arith.constant 0 : index
    %c0_16 = arith.constant 0 : index
    %20 = memref.load %arg7[%c0_15, %c0_16] : memref<1x1xf32, #tpu.memory_space<smem>>
    %21 = vector.broadcast %20 : f32 to vector<1x128xf32>
    %22 = arith.addf %19, %21 : vector<1x128xf32>
    %c0_17 = arith.constant 0 : index
    %c0_18 = arith.constant 0 : index
    %23 = vector.load %arg10[%c0_17, %c0_18] : memref<1x128xf32, #tpu.memory_space<vmem>>, vector<1x128xf32>
    tpu.vector_store %arg10[%c0_17, %c0_18], %22 {strides = array<i32>} : memref<1x128xf32, #tpu.memory_space<vmem>>, vector<1x128xf32>,
    %24 = vector.extract_strided_slice %0 {offsets = [0, 0], sizes = [16, 128], strides = [1, 1]} : vector<19x128xf32> to vector<16x128xf32>
    %c0_19 = arith.constant 0 : index
    %c0_20 = arith.constant 0 : index
    %25 = vector.load %arg8[%c0_19, %c0_20] : memref<3x16xf32, #tpu.memory_space<vmem>>, vector<3x16xf32>
    %cst_21 = arith.constant dense<0.000000e+00> : vector<3x128xf32>
    %26 = tpu.matmul %25, %24, %cst_21 {dimension_numbers = #tpu.dot_dimension_numbers<[1], [0], [0], [1], [0, 0, 1, 1], [], []>} : vector<3x16xf32>, vector<16x128xf32>, vector<3x128xf32> -> vector<3x128xf32>
    %c0_22 = arith.constant 0 : index
    %c0_23 = arith.constant 0 : index
    %27 = vector.load %arg9[%c0_22, %c0_23] : memref<3x1xf32, #tpu.memory_space<vmem>>, vector<3x1xf32>
    %28 = vector.broadcast %27 : vector<3x1xf32> to vector<3x128xf32>
    %29 = arith.addf %26, %28 : vector<3x128xf32>
    %30 = arith.negf %29 : vector<3x128xf32>
    %31 = math.exp %30 : vector<3x128xf32>
    %cst_24 = arith.constant 1.000000e+00 : f32
    %32 = vector.broadcast %cst_24 : f32 to vector<3x128xf32>
    %33 = arith.addf %32, %31 : vector<3x128xf32>
    %34 = arith.divf %32, %33 : vector<3x128xf32>
    %c0_25 = arith.constant 0 : index
    %c0_26 = arith.constant 0 : index
    %35 = vector.load %arg11[%c0_25, %c0_26] : memref<3x128xf32, #tpu.memory_space<vmem>>, vector<3x128xf32>
    tpu.vector_store %arg11[%c0_25, %c0_26], %34 {strides = array<i32>} : memref<3x128xf32, #tpu.memory_space<vmem>>, vector<3x128xf32>,
    return
  }
  func.func @transform_0(%arg0: i32) -> (i32, i32) {
    %c0_i32 = arith.constant 0 : i32
    %c0_i32_0 = arith.constant 0 : i32
    return %c0_i32, %arg0 : i32, i32
  }
  func.func @transform_1(%arg0: i32) -> (i32, i32) {
    %c0_i32 = arith.constant 0 : i32
    %c0_i32_0 = arith.constant 0 : i32
    %c0_i32_1 = arith.constant 0 : i32
    return %c0_i32, %c0_i32_0 : i32, i32
  }
  func.func @transform_2(%arg0: i32) -> (i32, i32) {
    %c0_i32 = arith.constant 0 : i32
    %c0_i32_0 = arith.constant 0 : i32
    %c0_i32_1 = arith.constant 0 : i32
    return %c0_i32, %c0_i32_0 : i32, i32
  }
  func.func @transform_3(%arg0: i32) -> (i32, i32) {
    %c0_i32 = arith.constant 0 : i32
    %c0_i32_0 = arith.constant 0 : i32
    %c0_i32_1 = arith.constant 0 : i32
    return %c0_i32, %c0_i32_0 : i32, i32
  }
  func.func @transform_4(%arg0: i32) -> (i32, i32) {
    %c0_i32 = arith.constant 0 : i32
    %c0_i32_0 = arith.constant 0 : i32
    %c0_i32_1 = arith.constant 0 : i32
    return %c0_i32, %c0_i32_0 : i32, i32
  }
  func.func @transform_5(%arg0: i32) -> (i32, i32) {
    %c0_i32 = arith.constant 0 : i32
    %c0_i32_0 = arith.constant 0 : i32
    %c0_i32_1 = arith.constant 0 : i32
    return %c0_i32, %c0_i32_0 : i32, i32
  }
  func.func @transform_6(%arg0: i32) -> (i32, i32) {
    %c0_i32 = arith.constant 0 : i32
    %c0_i32_0 = arith.constant 0 : i32
    %c0_i32_1 = arith.constant 0 : i32
    return %c0_i32, %c0_i32_0 : i32, i32
  }
  func.func @transform_7(%arg0: i32) -> (i32, i32) {
    %c0_i32 = arith.constant 0 : i32
    %c0_i32_0 = arith.constant 0 : i32
    %c0_i32_1 = arith.constant 0 : i32
    return %c0_i32, %c0_i32_0 : i32, i32
  }
  func.func @transform_8(%arg0: i32) -> (i32, i32) {
    %c0_i32 = arith.constant 0 : i32
    %c0_i32_0 = arith.constant 0 : i32
    %c0_i32_1 = arith.constant 0 : i32
    return %c0_i32, %c0_i32_0 : i32, i32
  }
  func.func @transform_9(%arg0: i32) -> (i32, i32) {
    %c0_i32 = arith.constant 0 : i32
    %c0_i32_0 = arith.constant 0 : i32
    return %c0_i32, %arg0 : i32, i32
  }
  func.func @transform_10(%arg0: i32) -> (i32, i32) {
    %c0_i32 = arith.constant 0 : i32
    %c0_i32_0 = arith.constant 0 : i32
    return %c0_i32, %arg0 : i32, i32
  }
}

</mosaic_0001>

<bundles_post_ra>
// kernel: qfourier_forward.1
= control target key start
LH: loop header
LB: loop body
LE: loop exit
PB: predicated region body
PF: predicated region fallthrough
CT: control target
= control target key end

     0   :  { %vm80_vm0 = vcmask 1042432   ;;  %vm67_vm1 = vcmask 154624   ;;  %v544_v5 = vmov 0   ;;  %v545_v10 = vmov 0.0   ;;  %s695_s0 = inlined_call_operand.vmem [shape: f32[19,128], index: 0, kind: input, shape index: {}]   ;;  %s696_s1 = inlined_call_operand.vmem [shape: f32[32,19], index: 1, kind: input, shape index: {}]   ;;  %s697_s2 = inlined_call_operand.vmem [shape: f32[32,1], index: 2, kind: input, shape index: {}]   ;;  %s698_s3 = inlined_call_operand.vmem [shape: f32[32,32], index: 3, kind: input, shape index: {}]   ;;  %s699_s4 = inlined_call_operand.vmem [shape: f32[32,1], index: 4, kind: input, shape index: {}]   ;;  %s700_s5 = inlined_call_operand.vmem [shape: f32[32,1], index: 5, kind: input, shape index: {}]   ;;  %s701_s6 = inlined_call_operand.<no memory space> [shape: f32[1,1], index: 6, kind: input, shape index: {}]   ;;  %s702_s7 = inlined_call_operand.vmem [shape: f32[3,16], index: 7, kind: input, shape index: {}]   ;;  %s703_s8 = inlined_call_operand.vmem [shape: f32[3,1], index: 8, kind: input, shape index: {}]   ;;  %s704_s9 = inlined_call_operand.vmem [shape: f32[1,128], index: 9, kind: output, shape index: {0}]   ;;  %s705_s10 = inlined_call_operand.hbm [shape: f32[3,128], index: 10, kind: output, shape index: {1}]  }
   0x1   :  { %v38_v0 = vld [vmem:[%s695_s0 + $0x10] sm:$0x7]  ;;  %v37_v1 = vld [vmem:[%s695_s0 + $0x8] sm:$0xff]  ;;  %v39_v2 = vld [vmem:[%s696_s1] sm:$0xff]  ;;  %516 = vset.pattern.permute.xlu0 %v544_v5  ;;  %517 = vset.pattern.permute.xlu1 %v544_v5 }
   0x2   :  { %479 = vmatprep.subr.msk.mxu0 %vm80_vm0, %v38_v0  ;;  %v36_v3 = vld [vmem:[%s695_s0] sm:$0xff]  ;;  %485 = vmatprep.mubr.msk.f32.mxu0 %vm67_vm1, %v39_v2  ;;  %v46_v4 = vld [vmem:[%s697_s2 + $0x18] sm:$0xff]  ;;  %v44_v6 = vld [vmem:[%s697_s2 + $0x8] sm:$0xff] }
   0x3   :  { %480 = vmatpush3.msk.msra.mxu0 %vm80_vm0, %v38_v0  ;;  %v40_v7 = vld [vmem:[%s696_s1 + $0x8] sm:$0xff]  ;;  %64 = vperm.xlu0 %516, %v46_v4   ;;  %v41_v8 = vld [vmem:[%s696_s1 + $0x10] sm:$0xff]  ;;  %v43_v11 = vld [vmem:[%s697_s2] sm:$0xff] }
   0x4   :  { %481 = vmatprep.subr.mxu0 %v37_v1  ;;  %v45_v9 = vld [vmem:[%s697_s2 + $0x10] sm:$0xff]  ;;  %54 = vperm.xlu1 %517, %v44_v6  }
   0x5   :  { %482 = vmatpush3.msra.mxu0 %v37_v1 }
   0x6   :  { %483 = vmatprep.subr.mxu0 %v36_v3 }
   0x7   :  { %484 = vmatpush3.msra.mxu0 %v36_v3 }
   0x8   :  { %486 = vmatmul.mubr.msk.f32.vlgmr.msra.gmra.mxu0 %vm67_vm1, %v40_v7  ;;  %505 = vmatprep.subr.mxu0 %v545_v10 }
   0x9   :  { %17 = vsyncpa [#allocation4], 0  ;;  %488 = vmatprep.mubr.msk.f32.mxu0 %vm67_vm1, %v41_v8  ;;  %v42_v12 = vld [vmem:[%s696_s1 + $0x18] sm:$0xff]  ;;  %506 = vmatpush3.msra.mxu0 %v37_v1  ;;  %v345_v13 = vld [vmem:[%s703_s8] sm:$0x7]  ;;  %vm546_vm2 = vmmov 0  }
   0xa   :  { %507 = vmatprep.subr.mxu0 %v545_v10  ;;  %59 = vperm.xlu0 %516, %v45_v9   ;;  %v177_v14 = vld [vmem:[%s699_s4] sm:$0xff]  ;;  %vm351_vm3 = vcmask 130048   ;;  %v178_v16 = vld [vmem:[%s699_s4 + $0x8] sm:$0xff]  ;;  %v179_v17 = vld [vmem:[%s699_s4 + $0x10] sm:$0xff]  ;;  %vm201_vm4 = vcmask 261120   ;;  %s547_s15 = smov [#allocation3]  }
   0xb   :  { %508 = vmatpush3.msra.mxu0 %v36_v3  ;;  %49 = vperm.xlu1 %517, %v43_v11   ;;  %v344_v15 = vld [vmem:[%s702_s7] sm:$0x7]  ;;  %v180_v18 = vld [vmem:[%s699_s4 + $0x18] sm:$0xff]  ;;  %v304_v20 = vld [vmem:[%s700_s5 + $0x8] sm:$0xff]  ;;  %s440_s16 = sshll.u32 %s547_s15, 4  ;;  %s441_s16 = int_to_ptr.vmem [resolvable:$true] %s440_s16 }
   0xc   :  { %489 = vmatmul.mubr.msk.f32.gmra.mxu0 %vm67_vm1, %v42_v12  ;;  %v303_v19 = vld [vmem:[%s700_s5] sm:$0xff]  ;;  %v305_v21 = vld [vmem:[%s700_s5 + $0x10] sm:$0xff]  ;;  %v306_v22 = vld [vmem:[%s700_s5 + $0x18] sm:$0xff]  ;;  %s522_s2 = scalar_lea.vmem %s441_s16, 64  ;;  %p527_p1 = scmp.lt.s32.totalorder %s441_s16, %s441_s16 }
   0xd   :  { %509 = vmatprep.mubr.msk.f32.mxu0 %vm546_vm2, %v545_v10  ;;  %v173_v23 = vld [vmem:[%s698_s3] sm:$0xff]  ;;  %v174_v45 = vld [vmem:[%s698_s3 + $0x8] sm:$0xff]  ;;  %v175_v46 = vld [vmem:[%s698_s3 + $0x10] sm:$0xff]  ;;  %p523_p0 = scmp.ne.s32.totalorder %s441_s16, %s522_s2  ;;  %p528_p2 = scmp.lt.s32.totalorder %s522_s2, %s522_s2 }
   0xe   :  { %348 = vperm.xlu0 %516, %v345_v13   ;;  %499 = vmatprep.mubr.msk.f32.mxu1 %vm201_vm4, %v173_v23  ;;  %v176_v47 = vld [vmem:[%s698_s3 + $0x18] sm:$0xff] }
   0xf   :  { %183 = vperm.xlu1 %517, %v177_v14   ;;  %p529_p3 = por %p528_p2, %p527_p1 }
  0x10   :  { %510 = vmatmul.mubr.msk.f32.vlgmr.msra.gmra.mxu0 %vm351_vm3, %v344_v15 }
  0x11   :  { %p530_p4 = pnand %p529_p3, %p523_p0 }
  0x12   :  { %188 = vperm.xlu0 %516, %v178_v16  }
  0x13   :  { %193 = vperm.xlu1 %517, %v179_v17  }
  0x16   :  { %198 = vperm.xlu0 %516, %v180_v18  }
  0x17   :  { %309 = vperm.xlu1 %517, %v303_v19  }
  0x1a   :  { %314 = vperm.xlu0 %516, %v304_v20  }
  0x1b   :  { %319 = vperm.xlu1 %517, %v305_v21  }
  0x1e   :  { %324 = vperm.xlu0 %516, %v306_v22  }
  0x7e   :  { %v65_v24 = vpop.permute.xlu0 %64 }
  0x7f   :  { %v55_v26 = vpop.permute.xlu1 %54 }
  0x85   :  { %v60_v27 = vpop.permute.xlu0 %59 }
  0x86   :  { %v50_v32 = vpop.permute.xlu1 %49 }
  0x89   :  { %v349_v36 = vpop.permute.xlu0 %348 }
  0xc8   :  { %v487_v25 = vpop.f32.mrf.mxu0 }
  0xc9   :  { %v156_v33 = vadd.f32 %v487_v25, %v55_v26 }
  0xca   :  { %v150_v28 = vpop.f32.mrf.mxu0 }
  0xcb   :  { %v151_v38 = vadd.f32 %v150_v28, %v50_v32  ;;  %v170_v42 = vmax.f32 %v156_v33, 0.0 }
  0xcc   :  { %v490_v29 = vpop.f32.mrf.mxu0 }
  0xcd   :  { %v166_v30 = vadd.f32 %v490_v29, %v65_v24  ;;  %v169_v44 = vmax.f32 %v151_v38, 0.0 }
  0xce   :  { %v160_v31 = vpop.f32.mrf.mxu0 }
  0xcf   :  { %v172_v34 = vmax.f32 %v166_v30, 0.0  ;;  %v161_v35 = vadd.f32 %v160_v31, %v60_v27 }
  0xd0   :  { %v421_v37 = vpop.f32.mrf.mxu0 }
  0xd1   :  { %v171_v39 = vmax.f32 %v161_v35, 0.0  ;;  %v422_v40 = vadd.f32 %v421_v37, %v349_v36  ;;  %491 = vmatprep.subr.mxu1 %v172_v34 }
  0xd2   :  { %492 = vmatpush3.msra.mxu1 %v172_v34  ;;  %v511_v41 = vpop.f32.mrf.mxu0 }
  0xd3   :  { %v460_v43 = vmul.f32 -1.442695, %v422_v40  ;;  %493 = vmatprep.subr.mxu1 %v171_v39 }
  0xd4   :  { %494 = vmatpush3.msra.mxu1 %v171_v39 }
  0xd5   :  { %518 = vpow2.f32 %v460_v43  ;;  %495 = vmatprep.subr.mxu1 %v170_v42 }
  0xd6   :  { %496 = vmatpush3.msra.mxu1 %v170_v42 }
  0xd7   :  { %497 = vmatprep.subr.mxu1 %v169_v44 }
  0xd8   :  { %498 = vmatpush3.msra.mxu1 %v169_v44 }
  0xd9   :  { %500 = vmatmul.mubr.msk.f32.vlgmr.msra.gmra.mxu1 %vm201_vm4, %v174_v45 }
  0xda   :  { %502 = vmatprep.mubr.msk.f32.mxu1 %vm201_vm4, %v175_v46 }
  0xdd   :  { %503 = vmatmul.mubr.msk.f32.gmra.mxu1 %vm201_vm4, %v176_v47 }
  0xe2   :  { %v519_v48 = vpop.eup %518 }
  0xe3   :  { %v428_v49 = vadd.f32 1.0, %v519_v48 }
  0xe5   :  { %520 = vrcp.f32 %v428_v49 }
  0xf2   :  { %v521_v50 = vpop.eup %520 }
  0xf3   :  { %431 = vst [vmem:[#allocation3] sm:$0x7] %v521_v50 }
  0xf4   :  { %533 = shalt.err (!%p530_p4)
}
  0xf5   :  { %443 = dma.vmem_to_hbm [thread:$0]  %s441_s16, 64, %s705_s10, [#allocation4]   ;;  %v184_v51 = vpop.permute.xlu1 %183  ;;  %v189_v52 = vpop.permute.xlu0 %188  ;;  %v341_v19 = vstv %s701_s6 }
  0xf9   :  { %v194_v53 = vpop.permute.xlu1 %193  ;;  %v199_v54 = vpop.permute.xlu0 %198 }
  0xfd   :  { %v310_v59 = vpop.permute.xlu1 %309  ;;  %v315_v0 = vpop.permute.xlu0 %314 }
 0x101   :  { %v320_v7 = vpop.permute.xlu1 %319  ;;  %v325_v10 = vpop.permute.xlu0 %324 }
 0x199   :  { %v501_v55 = vpop.f32.mrf.mxu1 }
 0x19a   :  { %v286_v56 = vadd.f32 %v501_v55, %v189_v52 }
 0x19b   :  { %v280_v57 = vpop.f32.mrf.mxu1 }
 0x19c   :  { %v281_v58 = vadd.f32 %v280_v57, %v184_v51  ;;  %v300_v61 = vmax.f32 %v286_v56, 0.0 }
 0x19d   :  { %v504_v60 = vpop.f32.mrf.mxu1 }
 0x19e   :  { %v299_v62 = vmax.f32 %v281_v58, 0.0  ;;  %v296_v63 = vadd.f32 %v504_v60, %v199_v54  ;;  %v328_v4 = vmul.f32 %v315_v0, %v300_v61 }
 0x19f   :  { %v290_v1 = vpop.f32.mrf.mxu1 }
 0x1a0   :  { %v327_v2 = vmul.f32 %v310_v59, %v299_v62  ;;  %v291_v3 = vadd.f32 %v290_v1, %v194_v53  ;;  %v302_v5 = vmax.f32 %v296_v63, 0.0 }
 0x1a2   :  { %v301_v6 = vmax.f32 %v291_v3, 0.0  ;;  %v331_v8 = vadd.f32 %v328_v4, %v327_v2  ;;  %v330_v11 = vmul.f32 %v325_v10, %v302_v5 }
 0x1a4   :  { %v329_v9 = vmul.f32 %v320_v7, %v301_v6 }
 0x1a6   :  { %v332_v12 = vadd.f32 %v331_v8, %v329_v9 }
 0x1a8   :  { %v333_v13 = vadd.f32 %v332_v12, %v330_v11 }
 0x1aa   :  { %v334_v14 = vrot.slane %v333_v13, 4 }
 0x1ac   :  { %v335_v15 = vadd.f32 %v334_v14, %v333_v13 }
 0x1ae   :  { %v336_v16 = vrot.slane %v335_v15, 2 }
 0x1b0   :  { %v337_v17 = vadd.f32 %v336_v16, %v335_v15 }
 0x1b2   :  { %v338_v18 = vrot.slane %v337_v17, 1 }
 0x1b4   :  { %v339_v20 = vadd.f32 %v338_v18, %v337_v17 }
 0x1b6   :  { %v342_v21 = vadd.f32 %v341_v19, %v339_v20 }
 0x1b8   :  { %343 = vst [vmem:[%s704_s9] sm:$0x1] %v342_v21 }
 0x1b9   :  { %542 = dma.done.wait [#allocation4], 64  }
 0x1ba   :  { %543 = vsyncadd [#allocation4], 4294967232 }
 0x1bb   :  { %449 = vsyncpa [#allocation4], 1 }

</bundles_post_ra>
